<compile_context>
chip_gen: v5e
topology: v5e:2x2
jax: 0.10.0
libtpu: 0.0.40
codegen_flags: <defaults>
</compile_context>

<pallas_src>
import functools

import jax
import jax.numpy as jnp
from jax.experimental import pallas as pl
from jax.experimental.pallas import tpu as pltpu


def _round_up(x: int, m: int) -> int:
    return (x + m - 1) // m * m


# ----------------------------- Pallas kernel ------------------------------ #
def _mlp_kernel(x_ref, w1_ref, b1_ref, w2_ref, b2_ref, w3_ref, b3_ref,
                o_ref, acc_ref):
    # grid = (batch_blocks, k_blocks); K (reduction over d_in) is the LAST axis.
    # x_ref:  (TB, TK)          f32 raw flattened input (DFT folded into w1)
    # w1_ref: (TK, H1P) bf16;   w2/w3: bf16, VMEM-resident (constant index map)
    # bK_ref: (1, fan_out_p)    f32
    # o_ref:  (TB, OUTP)        bf16
    # acc_ref:(TB, H1P)         f32 scratch accumulator for the K-tiled matmul
    k = pl.program_id(1)

    @pl.when(k == 0)
    def _init():
        acc_ref[...] = jnp.zeros_like(acc_ref)

    x = x_ref[...].astype(w1_ref.dtype)  # cast to bf16 in-register for MXU
    acc_ref[...] += jnp.dot(x, w1_ref[...], preferred_element_type=jnp.float32)

    @pl.when(k == pl.num_programs(1) - 1)
    def _finalize():
        h1 = jnp.maximum(acc_ref[...] + b1_ref[...], 0.0)
        h2 = jnp.dot(h1.astype(w2_ref.dtype), w2_ref[...],
                     preferred_element_type=jnp.float32) + b2_ref[...]
        h2 = jnp.maximum(h2, 0.0)
        h3 = jnp.dot(h2.astype(w3_ref.dtype), w3_ref[...],
                     preferred_element_type=jnp.float32) + b3_ref[...]
        o_ref[...] = h3.astype(o_ref.dtype)


def _spec(shape, index_map, single_buffer=False):
    """BlockSpec helper; constant-index operands get a single VMEM buffer."""
    if single_buffer:
        try:
            return pl.BlockSpec(shape, index_map, pipeline_mode=pl.Buffered(1))
        except TypeError:  # older API without pipeline_mode: fall back safely
            pass
    return pl.BlockSpec(shape, index_map)


def _pick_batch_tile(B, tk, h1_p, h2_p, out_p):
    """VMEM-aware batch tile (bytes budget, not a hard 256 cap)."""
    # ~12 MiB budget: fits v5e's 16 MiB scoped default, leaves ample headroom
    # on v7x's 64 MiB physical VMEM.
    budget = 12 * 1024 * 1024
    fixed = (2 * tk * h1_p * 2                       # w1 block (<=2 bufs, bf16)
             + h1_p * h2_p * 2 + h2_p * out_p * 2    # w2, w3 (bf16, resident)
             + 2 * (h1_p + h2_p + out_p) * 4)        # biases (f32)
    per_row = (2 * tk * 4        # x block, double-buffered, f32
               + 2 * out_p * 2   # out block, double-buffered, bf16
               + h1_p * 4)       # f32 accumulator scratch
    tb = (budget - fixed) // per_row
    tb = max(8, min(int(tb), 1024))  # 512-1024 amortizes ~0.35us/grid-step
    if B <= tb:
        return B                     # single full-dim batch block is legal
    return (tb // 8) * 8             # sublane-aligned tile; last block may be
                                     # ragged (rows are independent -> safe)


def _fused_mlp(x_flat, w1, b1, w2, b2, w3, b3, *, tk, nk):
    B, d_in_pp = x_flat.shape
    h1_p, h2_p, out_p = w1.shape[1], w2.shape[1], w3.shape[1]

    TB = _pick_batch_tile(B, tk, h1_p, h2_p, out_p)
    grid = (pl.cdiv(B, TB), nk)

    itemsize = lambda a: a.size * a.dtype.itemsize
    flops = 2 * B * (d_in_pp * h1_p + h1_p * h2_p + h2_p * out_p)
    bytes_accessed = (itemsize(x_flat) + itemsize(w1) + itemsize(b1)
                      + itemsize(w2) + itemsize(b2) + itemsize(w3)
                      + itemsize(b3) + B * out_p * 2)

    const = lambda i, k: (0, 0)
    return pl.pallas_call(
        _mlp_kernel,
        out_shape=jax.ShapeDtypeStruct((B, out_p), jnp.bfloat16),
        grid=grid,
        in_specs=[
            pl.BlockSpec((TB, tk), lambda i, k: (i, k)),              # x
            _spec((tk, h1_p), lambda i, k: (k, 0), single_buffer=(nk == 1)),  # w1
            _spec((1, h1_p), const, single_buffer=True),              # b1
            _spec((h1_p, h2_p), const, single_buffer=True),           # w2
            _spec((1, h2_p), const, single_buffer=True),              # b2
            _spec((h2_p, out_p), const, single_buffer=True),          # w3
            _spec((1, out_p), const, single_buffer=True),             # b3
        ],
        out_specs=pl.BlockSpec((TB, out_p), lambda i, k: (i, 0)),
        scratch_shapes=[pltpu.VMEM((TB, h1_p), jnp.float32)],
        compiler_params=pltpu.CompilerParams(
            # batch axis parallel (megacore), reduction axis last + arbitrary
            dimension_semantics=("parallel", "arbitrary"),
            vmem_limit_bytes=32 * 1024 * 1024),
        cost_estimate=pl.CostEstimate(flops=flops, transcendentals=0,
                                      bytes_accessed=bytes_accessed),
    )(x_flat, w1, b1, w2, b2, w3, b3)


# ------------------------------ Model wrapper ------------------------------ #
class FeedForwardFFT:
    H1 = 120    # logical fc1 out
    H2 = 84     # logical fc2 out
    OUT = 10    # logical fc3 out
    K_MAX = 2048  # max K tile (columns of x / rows of w1) per grid step

    def __init__(self, input_len: int, enc_in: int, key):
        self.input_len = input_len
        self.enc_in = enc_in
        L, C = input_len, enc_in
        d_in = L * C
        self.d_in = d_in

        # K tiling for the first matmul: tk divides the padded d_in exactly.
        d_in_p = _round_up(d_in, 128)
        self.nk = -(-d_in_p // self.K_MAX)
        self.tk = _round_up(-(-d_in_p // self.nk), 128)
        self.d_in_pp = self.nk * self.tk

        # padded (lane-dense, MXU-aligned) dims
        self.h1_p = _round_up(self.H1, 128)    # 128
        self.h2_p = _round_up(self.H2, 128)    # 128
        self.out_p = _round_up(self.OUT, 128)  # 128

        def init_linear(k, fan_in, fan_out):
            kw, kb = jax.random.split(k)
            bound = 1.0 / jnp.sqrt(jnp.float32(fan_in))
            # stored as (fan_in, fan_out), i.e. PyTorch weight transposed
            w = jax.random.uniform(kw, (fan_in, fan_out), jnp.float32, -bound, bound)
            b = jax.random.uniform(kb, (1, fan_out), jnp.float32, -bound, bound)
            return w, b

        k1, k2, k3 = jax.random.split(key, 3)
        w1, b1 = init_linear(k1, d_in, self.H1)
        w2, b2 = init_linear(k2, self.H1, self.H2)
        w3, b3 = init_linear(k3, self.H2, self.OUT)

        # Keep the original (unfolded, unpadded, f32) params for host-side
        # reference checks: reference = MLP(Re(fft(x, forward))) with these.
        self.ref_params = (w1, b1, w2, b2, w3, b3)

        # ---- Fold Re(forward-FFT over dim=1) into w1 (once, in f32). ----
        # Xr[l,c] = sum_n D[l,n] x[n,c],  D[l,n] = cos(2*pi*l*n/L)/L
        # => fc1(flatten(Xr))_j = sum_{n,c} x[n,c] * w1_eff[n*C+c, j]
        #    with w1_eff[n*C+c, j] = sum_l D[l,n] * w1[l*C+c, j]
        l_idx = jnp.arange(L, dtype=jnp.float32)[:, None]    # (L, 1) -> l
        n_idx = jnp.arange(L, dtype=jnp.float32)[None, :]    # (1, L) -> n
        D = jnp.cos(2.0 * jnp.pi * l_idx * n_idx / L) / L    # (L, L), D[l, n]
        w1_view = w1.reshape(L, C, self.H1)                  # [l, c, j]
        w1_eff = jnp.einsum('ln,lcj->ncj', D, w1_view).reshape(d_in, self.H1)

        def pad2(a, rows, cols):
            return jnp.pad(a, ((0, rows - a.shape[0]), (0, cols - a.shape[1])))

        # Zero-padding is exact: extra columns of layer k / extra rows of layer
        # k+1 are zero and ReLU(0)=0, so padded lanes never leak into outputs.
        self.w1 = pad2(w1_eff, self.d_in_pp, self.h1_p).astype(jnp.bfloat16)
        self.b1 = pad2(b1, 1, self.h1_p)                     # f32
        self.w2 = pad2(w2, self.h1_p, self.h2_p).astype(jnp.bfloat16)
        self.b2 = pad2(b2, 1, self.h2_p)                     # f32
        self.w3 = pad2(w3, self.h2_p, self.out_p).astype(jnp.bfloat16)
        self.b3 = pad2(b3, 1, self.out_p)                    # f32

    @functools.partial(jax.jit, static_argnums=0)
    def __call__(self, x, x_mark_enc=None, x_dec=None, x_mark_dec=None, mask=None):
        # x: (B, L, C) float32. The FFT is already folded into w1, so the raw
        # flattened input feeds the fused MLP kernel directly.
        B = x.shape[0]
        x_flat = x.reshape(B, self.d_in).astype(jnp.float32)
        if self.d_in_pp != self.d_in:   # trace-time branch
            x_flat = jnp.pad(x_flat, ((0, 0), (0, self.d_in_pp - self.d_in)))
        out_p = _fused_mlp(x_flat, self.w1, self.b1, self.w2, self.b2,
                           self.w3, self.b3, tk=self.tk, nk=self.nk)
        return out_p[:, :self.OUT].astype(jnp.float32)


# ---------------------------------- main ----------------------------------- #
if __name__ == "__main__":
    key = jax.random.PRNGKey(0)
    k_param, k_x, k_me, k_xd, k_md = jax.random.split(key, 5)

    B, L, C = 2, 16, 8  # batch, input_len, enc_in -> fc1 in_features = 128
    model = FeedForwardFFT(input_len=L, enc_in=C, key=k_param)

    x = jax.random.normal(k_x, (B, L, C), jnp.float32)
    x_mark_enc = jax.random.normal(k_me, (B, L, 4), jnp.float32)   # unused
    x_dec = jax.random.normal(k_xd, (B, L, C), jnp.float32)        # unused
    x_mark_dec = jax.random.normal(k_md, (B, L, 4), jnp.float32)   # unused

    out = model(x, x_mark_enc, x_dec, x_mark_dec)
    out = jax.block_until_ready(out)

    assert out.shape == (B, 10), out.shape
    assert bool(jnp.all(jnp.isfinite(out)))

    # Reference with the SAME semantics, applied the correct way round:
    # Re(forward FFT over dim=1) -> flatten -> f32 MLP with the ORIGINAL
    # (unfolded, unpadded) weights. Tolerance covers bf16 weight storage.
    w1o, b1o, w2o, b2o, w3o, b3o = model.ref_params
    xr = jnp.real(jnp.fft.fft(x, axis=1, norm="forward")).reshape(B, L * C)
    r = jnp.maximum(xr @ w1o + b1o, 0.0)
    r = jnp.maximum(r @ w2o + b2o, 0.0)
    r = r @ w3o + b3o
    max_err = float(jnp.max(jnp.abs(out - r)))
    assert bool(jnp.allclose(out, r, atol=2e-2, rtol=2e-2)), max_err

    print("KERNEL_OK")
</pallas_src>

<mosaic_0001>
module attributes {stable_mosaic.version = 11 : i64} {
  func.func @_mlp_kernel(%arg0: i32, %arg1: i32, %arg2: memref<2x128xf32, #tpu.memory_space<vmem>>, %arg3: memref<128x128xbf16, #tpu.memory_space<vmem>>, %arg4: memref<1x128xf32, #tpu.memory_space<vmem>>, %arg5: memref<128x128xbf16, #tpu.memory_space<vmem>>, %arg6: memref<1x128xf32, #tpu.memory_space<vmem>>, %arg7: memref<128x128xbf16, #tpu.memory_space<vmem>>, %arg8: memref<1x128xf32, #tpu.memory_space<vmem>>, %arg9: memref<2x128xbf16, #tpu.memory_space<vmem>>, %arg10: memref<2x128xf32, #tpu.memory_space<vmem>>) attributes {dimension_semantics = [#tpu.dimension_semantics<parallel>, #tpu.dimension_semantics<arbitrary>], iteration_bounds = array<i64: 1, 1>, scalar_prefetch = 0 : i64, scratch_operands = 1 : i64, tpu.core_type = #tpu.core_type<tc>, window_params = [{transform_indices = @transform_0, window_bounds = array<i64: 2, 128>}, {pipeline_mode = #tpu.pipeline_mode<synchronous>, transform_indices = @transform_1, window_bounds = array<i64: 128, 128>}, {pipeline_mode = #tpu.pipeline_mode<synchronous>, transform_indices = @transform_2, window_bounds = array<i64: 1, 128>}, {pipeline_mode = #tpu.pipeline_mode<synchronous>, transform_indices = @transform_3, window_bounds = array<i64: 128, 128>}, {pipeline_mode = #tpu.pipeline_mode<synchronous>, transform_indices = @transform_4, window_bounds = array<i64: 1, 128>}, {pipeline_mode = #tpu.pipeline_mode<synchronous>, transform_indices = @transform_5, window_bounds = array<i64: 128, 128>}, {pipeline_mode = #tpu.pipeline_mode<synchronous>, transform_indices = @transform_6, window_bounds = array<i64: 1, 128>}, {transform_indices = @transform_7, window_bounds = array<i64: 2, 128>}]} {
    %c0_i32 = arith.constant 0 : i32
    %0 = arith.cmpi eq, %arg1, %c0_i32 : i32
    %1 = arith.extui %0 : i1 to i32
    %c0_i32_0 = arith.constant 0 : i32
    %2 = arith.cmpi ne, %1, %c0_i32_0 : i32
    scf.if %2 {
      %cst_10 = arith.constant 0.000000e+00 : f32
      %13 = vector.broadcast %cst_10 : f32 to vector<2x128xf32>
      %c0_11 = arith.constant 0 : index
      %c0_12 = arith.constant 0 : index
      %14 = vector.load %arg10[%c0_11, %c0_12] : memref<2x128xf32, #tpu.memory_space<vmem>>, vector<2x128xf32>
      tpu.vector_store %arg10[%c0_11, %c0_12], %13 {strides = array<i32>} : memref<2x128xf32, #tpu.memory_space<vmem>>, vector<2x128xf32>,
    } else {
    }
    %c0 = arith.constant 0 : index
    %c0_1 = arith.constant 0 : index
    %3 = vector.load %arg2[%c0, %c0_1] : memref<2x128xf32, #tpu.memory_space<vmem>>, vector<2x128xf32>
    %4 = arith.truncf %3 : vector<2x128xf32> to vector<2x128xbf16>
    %c0_2 = arith.constant 0 : index
    %c0_3 = arith.constant 0 : index
    %5 = vector.load %arg10[%c0_2, %c0_3] : memref<2x128xf32, #tpu.memory_space<vmem>>, vector<2x128xf32>
    %c0_4 = arith.constant 0 : index
    %c0_5 = arith.constant 0 : index
    %6 = vector.load %arg3[%c0_4, %c0_5] : memref<128x128xbf16, #tpu.memory_space<vmem>>, vector<128x128xbf16>
    %cst = arith.constant dense<0.000000e+00> : vector<2x128xf32>
    %7 = tpu.matmul %4, %6, %cst {dimension_numbers = #tpu.dot_dimension_numbers<[1], [0], [0], [1], [0, 0, 1, 1], [], []>} : vector<2x128xbf16>, vector<128x128xbf16>, vector<2x128xf32> -> vector<2x128xf32>
    %8 = arith.addf %5, %7 : vector<2x128xf32>
    %c0_6 = arith.constant 0 : index
    %c0_7 = arith.constant 0 : index
    %9 = vector.load %arg10[%c0_6, %c0_7] : memref<2x128xf32, #tpu.memory_space<vmem>>, vector<2x128xf32>
    tpu.vector_store %arg10[%c0_6, %c0_7], %8 {strides = array<i32>} : memref<2x128xf32, #tpu.memory_space<vmem>>, vector<2x128xf32>,
    %c0_i32_8 = arith.constant 0 : i32
    %10 = arith.cmpi eq, %arg1, %c0_i32_8 : i32
    %11 = arith.extui %10 : i1 to i32
    %c0_i32_9 = arith.constant 0 : i32
    %12 = arith.cmpi ne, %11, %c0_i32_9 : i32
    scf.if %12 {
      %c0_10 = arith.constant 0 : index
      %c0_11 = arith.constant 0 : index
      %13 = vector.load %arg10[%c0_10, %c0_11] : memref<2x128xf32, #tpu.memory_space<vmem>>, vector<2x128xf32>
      %c0_12 = arith.constant 0 : index
      %c0_13 = arith.constant 0 : index
      %14 = vector.load %arg4[%c0_12, %c0_13] : memref<1x128xf32, #tpu.memory_space<vmem>>, vector<1x128xf32>
      %15 = vector.broadcast %14 : vector<1x128xf32> to vector<2x128xf32>
      %16 = arith.addf %13, %15 : vector<2x128xf32>
      %cst_14 = arith.constant 0.000000e+00 : f32
      %17 = vector.broadcast %cst_14 : f32 to vector<2x128xf32>
      %18 = arith.maximumf %16, %17 : vector<2x128xf32>
      %19 = arith.truncf %18 : vector<2x128xf32> to vector<2x128xbf16>
      %c0_15 = arith.constant 0 : index
      %c0_16 = arith.constant 0 : index
      %20 = vector.load %arg5[%c0_15, %c0_16] : memref<128x128xbf16, #tpu.memory_space<vmem>>, vector<128x128xbf16>
      %cst_17 = arith.constant dense<0.000000e+00> : vector<2x128xf32>
      %21 = tpu.matmul %19, %20, %cst_17 {dimension_numbers = #tpu.dot_dimension_numbers<[1], [0], [0], [1], [0, 0, 1, 1], [], []>} : vector<2x128xbf16>, vector<128x128xbf16>, vector<2x128xf32> -> vector<2x128xf32>
      %c0_18 = arith.constant 0 : index
      %c0_19 = arith.constant 0 : index
      %22 = vector.load %arg6[%c0_18, %c0_19] : memref<1x128xf32, #tpu.memory_space<vmem>>, vector<1x128xf32>
      %23 = vector.broadcast %22 : vector<1x128xf32> to vector<2x128xf32>
      %24 = arith.addf %21, %23 : vector<2x128xf32>
      %cst_20 = arith.constant 0.000000e+00 : f32
      %25 = vector.broadcast %cst_20 : f32 to vector<2x128xf32>
      %26 = arith.maximumf %24, %25 : vector<2x128xf32>
      %27 = arith.truncf %26 : vector<2x128xf32> to vector<2x128xbf16>
      %c0_21 = arith.constant 0 : index
      %c0_22 = arith.constant 0 : index
      %28 = vector.load %arg7[%c0_21, %c0_22] : memref<128x128xbf16, #tpu.memory_space<vmem>>, vector<128x128xbf16>
      %cst_23 = arith.constant dense<0.000000e+00> : vector<2x128xf32>
      %29 = tpu.matmul %27, %28, %cst_23 {dimension_numbers = #tpu.dot_dimension_numbers<[1], [0], [0], [1], [0, 0, 1, 1], [], []>} : vector<2x128xbf16>, vector<128x128xbf16>, vector<2x128xf32> -> vector<2x128xf32>
      %c0_24 = arith.constant 0 : index
      %c0_25 = arith.constant 0 : index
      %30 = vector.load %arg8[%c0_24, %c0_25] : memref<1x128xf32, #tpu.memory_space<vmem>>, vector<1x128xf32>
      %31 = vector.broadcast %30 : vector<1x128xf32> to vector<2x128xf32>
      %32 = arith.addf %29, %31 : vector<2x128xf32>
      %33 = arith.truncf %32 : vector<2x128xf32> to vector<2x128xbf16>
      %c0_26 = arith.constant 0 : index
      %c0_27 = arith.constant 0 : index
      %34 = vector.load %arg9[%c0_26, %c0_27] : memref<2x128xbf16, #tpu.memory_space<vmem>>, vector<2x128xbf16>
      tpu.vector_store %arg9[%c0_26, %c0_27], %33 {strides = array<i32>} : memref<2x128xbf16, #tpu.memory_space<vmem>>, vector<2x128xbf16>,
    } else {
    }
    return
  }
  func.func @transform_0(%arg0: i32, %arg1: i32) -> (i32, i32) {
    %c0_i32 = arith.constant 0 : i32
    return %arg0, %arg1 : i32, i32
  }
  func.func @transform_1(%arg0: i32, %arg1: i32) -> (i32, i32) {
    %c0_i32 = arith.constant 0 : i32
    %c0_i32_0 = arith.constant 0 : i32
    return %arg1, %c0_i32 : i32, i32
  }
  func.func @transform_2(%arg0: i32, %arg1: i32) -> (i32, i32) {
    %c0_i32 = arith.constant 0 : i32
    %c0_i32_0 = arith.constant 0 : i32
    %c0_i32_1 = arith.constant 0 : i32
    return %c0_i32, %c0_i32_0 : i32, i32
  }
  func.func @transform_3(%arg0: i32, %arg1: i32) -> (i32, i32) {
    %c0_i32 = arith.constant 0 : i32
    %c0_i32_0 = arith.constant 0 : i32
    %c0_i32_1 = arith.constant 0 : i32
    return %c0_i32, %c0_i32_0 : i32, i32
  }
  func.func @transform_4(%arg0: i32, %arg1: i32) -> (i32, i32) {
    %c0_i32 = arith.constant 0 : i32
    %c0_i32_0 = arith.constant 0 : i32
    %c0_i32_1 = arith.constant 0 : i32
    return %c0_i32, %c0_i32_0 : i32, i32
  }
  func.func @transform_5(%arg0: i32, %arg1: i32) -> (i32, i32) {
    %c0_i32 = arith.constant 0 : i32
    %c0_i32_0 = arith.constant 0 : i32
    %c0_i32_1 = arith.constant 0 : i32
    return %c0_i32, %c0_i32_0 : i32, i32
  }
  func.func @transform_6(%arg0: i32, %arg1: i32) -> (i32, i32) {
    %c0_i32 = arith.constant 0 : i32
    %c0_i32_0 = arith.constant 0 : i32
    %c0_i32_1 = arith.constant 0 : i32
    return %c0_i32, %c0_i32_0 : i32, i32
  }
  func.func @transform_7(%arg0: i32, %arg1: i32) -> (i32, i32) {
    %c0_i32 = arith.constant 0 : i32
    %c0_i32_0 = arith.constant 0 : i32
    return %arg0, %c0_i32 : i32, i32
  }
}

</mosaic_0001>

<bundles_post_ra>
// kernel: a_call__.1
= control target key start
LH: loop header
LB: loop body
LE: loop exit
PB: predicated region body
PF: predicated region fallthrough
CT: control target
= control target key end

     0   :  { %12 = vsyncpa [#allocation4], 0  ;;  %s598_s0 = inlined_call_operand.vmem [shape: f32[2,128], index: 0, kind: input, shape index: {}]   ;;  %s599_s1 = inlined_call_operand.hbm [shape: bf16[128,128], index: 1, kind: input, shape index: {}]   ;;  %s600_s2 = inlined_call_operand.vmem [shape: f32[1,128], index: 2, kind: input, shape index: {}]   ;;  %s601_s3 = inlined_call_operand.hbm [shape: bf16[128,128], index: 3, kind: input, shape index: {}]   ;;  %s602_s4 = inlined_call_operand.vmem [shape: f32[1,128], index: 4, kind: input, shape index: {}]   ;;  %s603_s5 = inlined_call_operand.vmem [shape: bf16[128,128], index: 5, kind: input, shape index: {}]   ;;  %s604_s6 = inlined_call_operand.vmem [shape: f32[1,128], index: 6, kind: input, shape index: {}]   ;;  %s605_s7 = inlined_call_operand.vmem [shape: bf16[2,128], index: 7, kind: output, shape index: {}]  }
   0x1   :  { %s20_s26 = sshll.u32 %s599_s1, 4  ;;  %s21_s26 = int_to_ptr.hbm [resolvable:$true] %s20_s26 }
   0x2   :  { %13 = vsyncpa [#allocation6], 0  ;;  %s508_s27 = smov [#allocation3]   ;;  %s35_s8 = sshll.u32 %s601_s3, 4  ;;  %s36_s8 = int_to_ptr.hbm [resolvable:$true] %s35_s8 }
   0x3   :  { %s22_s28 = sshll.u32 %s508_s27, 4  ;;  %s509_s9 = smov 64   ;;  %s23_s28 = int_to_ptr.vmem [resolvable:$true] %s22_s28 }
   0x4   :  { %s510_s10 = smov 4   ;;  %s511_s11 = smov [#allocation5]  }
   0x5   :  { %28 = dma.hbm_to_vmem [thread:$0]  %s21_s26, 1024, %s23_s28, [#allocation4], %s509_s9, %s509_s9, %s510_s10  }
   0x6   :  { %s37_s12 = sshll.u32 %s511_s11, 4  ;;  %s38_s12 = int_to_ptr.vmem [resolvable:$true] %s37_s12 }
   0x7   :  { %43 = dma.hbm_to_vmem [thread:$0]  %s36_s8, 1024, %s38_s12, [#allocation6], %s509_s9, %s509_s9, %s510_s10  }
   0x8   :  { %504 = dma.done.wait [#allocation4], 1024  }
   0x9   :  { %505 = vsyncadd [#allocation4], 4294966272 }
   0xa   :  { %506 = dma.done.wait [#allocation6], 1024  }
   0xb   :  { %507 = vsyncadd [#allocation6], 4294966272  ;;  %v431_v0 = vld [vmem:[#allocation3 + $0x38] sm:$0xff]  ;;  %v430_v1 = vld [vmem:[#allocation3 + $0x30] sm:$0xff]  ;;  %v512_v2 = vmov 0.0  }
   0xc   :  { %130 = vmatpush.bf16.msra.mxu0 %v431_v0  ;;  %62 = vst [vmem:[#allocation2] sm:$0x3] %v512_v2  ;;  %v439_v3 = vld [vmem:[#allocation5 + $0x38] sm:$0xff]  ;;  %v438_v4 = vld [vmem:[#allocation5 + $0x30] sm:$0xff]  ;;  %v429_v5 = vld [vmem:[#allocation3 + $0x28] sm:$0xff] }
   0xd   :  { %224 = vmatpush.bf16.msra.mxu1 %v439_v3  ;;  %v437_v6 = vld [vmem:[#allocation5 + $0x28] sm:$0xff]  ;;  %v428_v7 = vld [vmem:[#allocation3 + $0x20] sm:$0xff]  ;;  %v427_v9 = vld [vmem:[#allocation3 + $0x18] sm:$0xff] }
   0xe   :  { %v436_v8 = vld [vmem:[#allocation5 + $0x20] sm:$0xff]  ;;  %v426_v10 = vld [vmem:[#allocation3 + $0x10] sm:$0xff]  ;;  %v425_v11 = vld [vmem:[#allocation3 + $0x8] sm:$0xff] }
   0xf   :  { %v424_v12 = vld [vmem:[#allocation3] sm:$0xff]  ;;  %v63_v13 = vld [vmem:[%s598_s0] sm:$0x3]  ;;  %v434_v16 = vld [vmem:[#allocation5 + $0x10] sm:$0xff] }
  0x10   :  { %131 = vmatpush.bf16.msra.mxu0 %v430_v1  ;;  %v64_v14 = vpack.c.bf16 %v63_v13, %v63_v13  ;;  %v435_v15 = vld [vmem:[#allocation5 + $0x18] sm:$0xff]  ;;  %v433_v17 = vld [vmem:[#allocation5 + $0x8] sm:$0xff]  ;;  %v432_v18 = vld [vmem:[#allocation5] sm:$0xff] }
  0x11   :  { %225 = vmatpush.bf16.msra.mxu1 %v438_v4  ;;  %v447_v19 = vld [vmem:[%s603_s5 + $0x38] sm:$0xff]  ;;  %v446_v20 = vld [vmem:[%s603_s5 + $0x30] sm:$0xff]  ;;  %v445_v21 = vld [vmem:[%s603_s5 + $0x28] sm:$0xff] }
  0x12   :  { %307 = vmatpush.bf16.msra.mxu2 %v447_v19  ;;  %v444_v22 = vld [vmem:[%s603_s5 + $0x20] sm:$0xff]  ;;  %v443_v24 = vld [vmem:[%s603_s5 + $0x18] sm:$0xff]  ;;  %v442_v27 = vld [vmem:[%s603_s5 + $0x10] sm:$0xff] }
  0x13   :  { %v65_v23 = vld [vmem:[#allocation2] sm:$0x3]  ;;  %v441_v34 = vld [vmem:[%s603_s5 + $0x8] sm:$0xff] }
  0x14   :  { %132 = vmatpush.bf16.msra.mxu0 %v429_v5  ;;  %v453_v28 = vld [vmem:[%s600_s2] ss:$0 sm:$0xff] }
  0x15   :  { %226 = vmatpush.bf16.msra.mxu1 %v437_v6  ;;  %v440_v35 = vld [vmem:[%s603_s5] sm:$0xff] }
  0x16   :  { %308 = vmatpush.bf16.msra.mxu2 %v446_v20  ;;  %v454_v36 = vld [vmem:[%s602_s4] ss:$0 sm:$0xff] }
  0x17   :  { %v455_v42 = vld [vmem:[%s604_s6] ss:$0 sm:$0xff] }
  0x18   :  { %133 = vmatpush.bf16.msra.mxu0 %v428_v7 }
  0x19   :  { %227 = vmatpush.bf16.msra.mxu1 %v436_v8 }
  0x1a   :  { %309 = vmatpush.bf16.msra.mxu2 %v445_v21 }
  0x1c   :  { %134 = vmatpush.bf16.msra.mxu0 %v427_v9 }
  0x1d   :  { %228 = vmatpush.bf16.msra.mxu1 %v435_v15 }
  0x1e   :  { %310 = vmatpush.bf16.msra.mxu2 %v444_v22 }
  0x20   :  { %135 = vmatpush.bf16.msra.mxu0 %v426_v10 }
  0x21   :  { %229 = vmatpush.bf16.msra.mxu1 %v434_v16 }
  0x22   :  { %311 = vmatpush.bf16.msra.mxu2 %v443_v24 }
  0x24   :  { %136 = vmatpush.bf16.msra.mxu0 %v425_v11 }
  0x25   :  { %230 = vmatpush.bf16.msra.mxu1 %v433_v17 }
  0x26   :  { %312 = vmatpush.bf16.msra.mxu2 %v442_v27 }
  0x28   :  { %137 = vmatpush.bf16.msra.mxu0 %v424_v12 }
  0x29   :  { %231 = vmatpush.bf16.msra.mxu1 %v432_v18 }
  0x2a   :  { %313 = vmatpush.bf16.msra.mxu2 %v441_v34 }
  0x2b   :  { %138 = vmatmul.bf16.vlgmr.msra.gmra.mxu0 %v64_v14 }
  0x2e   :  { %314 = vmatpush.bf16.msra.mxu2 %v440_v35 }
  0xa8   :  { %v139_v25 = vpop.f32.mrf.mxu0 }
  0xa9   :  { %v143_v26 = vadd.f32 %v139_v25, %v65_v23 }
  0xab   :  { %144 = vst [vmem:[#allocation2] sm:$0x3] %v143_v26 }
  0xb0   :  { %v141_v29 = vpop.f32.mrf.mxu0 }
  0xb2   :  { %v148_v30 = vld [vmem:[#allocation2] sm:$0x3] }
  0xb3   :  { %v153_v31 = vadd.f32 %v453_v28, %v148_v30 }
  0xb5   :  { %v154_v32 = vmax.f32 %v153_v31, 0.0 }
  0xb7   :  { %v155_v33 = vpack.c.bf16 %v154_v32, %v154_v32 }
  0xb9   :  { %232 = vmatmul.bf16.vlgmr.msra.gmra.mxu1 %v155_v33 }
 0x136   :  { %v233_v37 = vpop.f32.mrf.mxu1 }
 0x137   :  { %v234_v38 = vadd.f32 %v454_v36, %v233_v37 }
 0x139   :  { %v237_v39 = vmax.f32 %v234_v38, 0.0 }
 0x13b   :  { %v238_v40 = vpack.c.bf16 %v237_v39, %v237_v39 }
 0x13d   :  { %315 = vmatmul.bf16.vlgmr.msra.gmra.mxu2 %v238_v40 }
 0x13e   :  { %v235_v41 = vpop.f32.mrf.mxu1 }
 0x1c0   :  { %v316_v43 = vpop.f32.mrf.mxu2 }
 0x1c1   :  { %v317_v44 = vadd.f32 %v455_v42, %v316_v43 }
 0x1c3   :  { %v320_v45 = vpack.c.bf16 %v317_v44, %v317_v44 }
 0x1c5   :  { %321 = vst [vmem:[%s605_s7] sm:$0x1] %v320_v45 }
 0x1c8   :  { %v318_v46 = vpop.f32.mrf.mxu2 }
 0x1c9   :  { %326 = vsyncpa [#allocation4], 1 }
 0x1ca   :  { %327 = vsyncpa [#allocation6], 1 }

</bundles_post_ra>
